<compile_context>
chip_gen: v7x
topology: tpu7x:2x2x1
jax: 0.10.0
libtpu: 0.0.40
codegen_flags: <defaults>
</compile_context>

<pallas_src>
import jax
import jax.numpy as jnp
from jax.experimental import pallas as pl
from jax.experimental.pallas import tpu as pltpu

IN_FEATURES = 512
OUT_FEATURES = 10
NPAD = 128            # lane-dense padded width for hidden / output
MAX_TB = 1024         # batch-tile cap (f32 x tile, double-buffered ~4 MiB)


def _round_up(n, m):
    return (n + m - 1) // m * m


def _choose_tb(B):
    """Batch tile size.

    * B <= 512: one grid step.  Use B itself when already 8-row aligned
      (exact tile, no masked tail); otherwise round up to 16 and let Pallas
      mask the ragged tail.
    * B  > 512: at least two grid steps so the "parallel" batch axis can be
      sharded across both TensorCores on v7x, capped at MAX_TB rows.
    """
    if B <= 512:
        return B if B % 8 == 0 else _round_up(B, 16)
    return min(MAX_TB, _round_up(pl.cdiv(B, 2), 16))


def mlp_kernel(x_ref, w1_ref, b1_ref, w2_ref, b2_ref, o_ref):
    # x_ref : [TB, 512]  f32   (cast to bf16 here -- rides the VPU slot, free
    #                           under the HBM-DMA bound; no wrapper cast pass)
    # w1_ref: [512, 128] bf16 | b1_ref: [1, 128] f32
    # w2_ref: [128, 128] bf16 | b2_ref: [1, 128] f32
    # o_ref : [TB, 128]  bf16
    x = x_ref[...].astype(w1_ref.dtype)
    h = jnp.dot(x, w1_ref[...], preferred_element_type=jnp.float32)   # [TB,128] f32
    h = jnp.maximum(h + b1_ref[...], 0.0)                             # ReLU(fc1)
    y = jnp.dot(h.astype(w2_ref.dtype), w2_ref[...],
                preferred_element_type=jnp.float32)                   # [TB,128] f32
    y = jnp.maximum(y + b2_ref[...], 0.0)                             # ReLU(fc2)
    o_ref[...] = y.astype(o_ref.dtype)                                # bf16 writeback


def prepare_params(w1, b1, w2, b2, compute_dtype=jnp.bfloat16):
    """One-time prep: transpose to [in, out], zero-pad out-dim 10 -> 128, cast.

    w1: [10, 512], b1: [10], w2: [10, 10], b2: [10]  (PyTorch layout).
    """
    w1p = jnp.zeros((IN_FEATURES, NPAD), compute_dtype)
    w1p = w1p.at[:, :OUT_FEATURES].set(w1.T.astype(compute_dtype))
    b1p = jnp.zeros((1, NPAD), jnp.float32)
    b1p = b1p.at[:, :OUT_FEATURES].set(b1.astype(jnp.float32))
    w2p = jnp.zeros((NPAD, NPAD), compute_dtype)
    w2p = w2p.at[:OUT_FEATURES, :OUT_FEATURES].set(w2.T.astype(compute_dtype))
    b2p = jnp.zeros((1, NPAD), jnp.float32)
    b2p = b2p.at[:, :OUT_FEATURES].set(b2.astype(jnp.float32))
    return w1p, b1p, w2p, b2p


def net_forward(x, params):
    """x: [B, 512] float32; params: output of prepare_params.  Returns [B, 10] f32."""
    w1p, b1p, w2p, b2p = params
    B = x.shape[0]
    TB = _choose_tb(B)
    grid = (pl.cdiv(B, TB),)

    cost = pl.CostEstimate(
        flops=2 * B * IN_FEATURES * NPAD + 2 * B * NPAD * NPAD,
        transcendentals=0,
        bytes_accessed=(B * IN_FEATURES * 4                          # x (f32) read
                        + (IN_FEATURES * NPAD + NPAD * NPAD) * 2     # bf16 weights
                        + 2 * NPAD * 4                               # f32 biases
                        + B * NPAD * 2),                             # bf16 out write
    )

    out = pl.pallas_call(
        mlp_kernel,
        out_shape=jax.ShapeDtypeStruct((B, NPAD), jnp.bfloat16),
        grid_spec=pltpu.PrefetchScalarGridSpec(
            num_scalar_prefetch=0,
            grid=grid,
            in_specs=[
                pl.BlockSpec((TB, IN_FEATURES), lambda i: (i, 0)),    # x tile (f32)
                # Constant index_maps -> fetched once (Pallas skips re-DMA when
                # the block index does not change across grid steps).
                pl.BlockSpec((IN_FEATURES, NPAD), lambda i: (0, 0)),  # w1 resident
                pl.BlockSpec((1, NPAD), lambda i: (0, 0)),            # b1 resident
                pl.BlockSpec((NPAD, NPAD), lambda i: (0, 0)),         # w2 resident
                pl.BlockSpec((1, NPAD), lambda i: (0, 0)),            # b2 resident
            ],
            out_specs=pl.BlockSpec((TB, NPAD), lambda i: (i, 0)),
        ),
        compiler_params=pltpu.CompilerParams(
            dimension_semantics=("parallel",),   # batch axis -> both TCs on v7x
        ),
        cost_estimate=cost,
    )(x, w1p, b1p, w2p, b2p)

    # Only the first 10 lanes are real outputs; padded lanes are exactly 0.
    return out[:, :OUT_FEATURES].astype(jnp.float32)


def init_params(key):
    """Deterministic init mimicking PyTorch Linear default U[-1/sqrt(fan_in), +]."""
    k1, k2, k3, k4 = jax.random.split(key, 4)
    lim1 = 1.0 / jnp.sqrt(float(IN_FEATURES))
    lim2 = 1.0 / jnp.sqrt(float(OUT_FEATURES))
    w1 = jax.random.uniform(k1, (OUT_FEATURES, IN_FEATURES), jnp.float32, -lim1, lim1)
    b1 = jax.random.uniform(k2, (OUT_FEATURES,), jnp.float32, -lim1, lim1)
    w2 = jax.random.uniform(k3, (OUT_FEATURES, OUT_FEATURES), jnp.float32, -lim2, lim2)
    b2 = jax.random.uniform(k4, (OUT_FEATURES,), jnp.float32, -lim2, lim2)
    return w1, b1, w2, b2


if __name__ == "__main__":
    key = jax.random.PRNGKey(0)
    kx, kp = jax.random.split(key)
    B = 8
    x = jax.random.normal(kx, (B, IN_FEATURES), dtype=jnp.float32)
    w1, b1, w2, b2 = init_params(kp)

    params = prepare_params(w1, b1, w2, b2)      # one-time transpose/pad/cast
    out = net_forward(x, params)
    out = jax.block_until_ready(out)

    # Pure-JAX f32 reference (tolerance covers the bf16 MXU path + bf16 output).
    ref = jnp.maximum(x @ w1.T + b1, 0.0)
    ref = jnp.maximum(ref @ w2.T + b2, 0.0)

    assert out.shape == (B, OUT_FEATURES)
    assert jnp.allclose(out, ref, atol=5e-2, rtol=5e-2), (
        f"max abs diff {jnp.max(jnp.abs(out - ref))}")
    print("KERNEL_OK")
</pallas_src>

<mosaic_0001>
module attributes {stable_mosaic.version = 11 : i64} {
  func.func @mlp_kernel(%arg0: i32, %arg1: memref<8x512xf32, #tpu.memory_space<vmem>>, %arg2: memref<512x128xbf16, #tpu.memory_space<vmem>>, %arg3: memref<1x128xf32, #tpu.memory_space<vmem>>, %arg4: memref<128x128xbf16, #tpu.memory_space<vmem>>, %arg5: memref<1x128xf32, #tpu.memory_space<vmem>>, %arg6: memref<8x128xbf16, #tpu.memory_space<vmem>>) attributes {dimension_semantics = [#tpu.dimension_semantics<parallel>], iteration_bounds = array<i64: 1>, scalar_prefetch = 0 : i64, scratch_operands = 0 : i64, tpu.core_type = #tpu.core_type<tc>, window_params = [{transform_indices = @transform_0, window_bounds = array<i64: 8, 512>}, {pipeline_mode = #tpu.pipeline_mode<synchronous>, transform_indices = @transform_1, window_bounds = array<i64: 512, 128>}, {pipeline_mode = #tpu.pipeline_mode<synchronous>, transform_indices = @transform_2, window_bounds = array<i64: 1, 128>}, {pipeline_mode = #tpu.pipeline_mode<synchronous>, transform_indices = @transform_3, window_bounds = array<i64: 128, 128>}, {pipeline_mode = #tpu.pipeline_mode<synchronous>, transform_indices = @transform_4, window_bounds = array<i64: 1, 128>}, {transform_indices = @transform_5, window_bounds = array<i64: 8, 128>}]} {
    %c0 = arith.constant 0 : index
    %c0_0 = arith.constant 0 : index
    %0 = vector.load %arg1[%c0, %c0_0] : memref<8x512xf32, #tpu.memory_space<vmem>>, vector<8x512xf32>
    %1 = arith.truncf %0 : vector<8x512xf32> to vector<8x512xbf16>
    %c0_1 = arith.constant 0 : index
    %c0_2 = arith.constant 0 : index
    %2 = vector.load %arg2[%c0_1, %c0_2] : memref<512x128xbf16, #tpu.memory_space<vmem>>, vector<512x128xbf16>
    %cst = arith.constant dense<0.000000e+00> : vector<8x128xf32>
    %3 = tpu.matmul %1, %2, %cst {dimension_numbers = #tpu.dot_dimension_numbers<[1], [0], [0], [1], [0, 0, 1, 1], [], []>} : vector<8x512xbf16>, vector<512x128xbf16>, vector<8x128xf32> -> vector<8x128xf32>
    %c0_3 = arith.constant 0 : index
    %c0_4 = arith.constant 0 : index
    %4 = vector.load %arg3[%c0_3, %c0_4] : memref<1x128xf32, #tpu.memory_space<vmem>>, vector<1x128xf32>
    %5 = vector.broadcast %4 : vector<1x128xf32> to vector<8x128xf32>
    %6 = arith.addf %3, %5 : vector<8x128xf32>
    %cst_5 = arith.constant 0.000000e+00 : f32
    %7 = vector.broadcast %cst_5 : f32 to vector<8x128xf32>
    %8 = arith.maximumf %6, %7 : vector<8x128xf32>
    %9 = arith.truncf %8 : vector<8x128xf32> to vector<8x128xbf16>
    %c0_6 = arith.constant 0 : index
    %c0_7 = arith.constant 0 : index
    %10 = vector.load %arg4[%c0_6, %c0_7] : memref<128x128xbf16, #tpu.memory_space<vmem>>, vector<128x128xbf16>
    %cst_8 = arith.constant dense<0.000000e+00> : vector<8x128xf32>
    %11 = tpu.matmul %9, %10, %cst_8 {dimension_numbers = #tpu.dot_dimension_numbers<[1], [0], [0], [1], [0, 0, 1, 1], [], []>} : vector<8x128xbf16>, vector<128x128xbf16>, vector<8x128xf32> -> vector<8x128xf32>
    %c0_9 = arith.constant 0 : index
    %c0_10 = arith.constant 0 : index
    %12 = vector.load %arg5[%c0_9, %c0_10] : memref<1x128xf32, #tpu.memory_space<vmem>>, vector<1x128xf32>
    %13 = vector.broadcast %12 : vector<1x128xf32> to vector<8x128xf32>
    %14 = arith.addf %11, %13 : vector<8x128xf32>
    %cst_11 = arith.constant 0.000000e+00 : f32
    %15 = vector.broadcast %cst_11 : f32 to vector<8x128xf32>
    %16 = arith.maximumf %14, %15 : vector<8x128xf32>
    %17 = arith.truncf %16 : vector<8x128xf32> to vector<8x128xbf16>
    %c0_12 = arith.constant 0 : index
    %c0_13 = arith.constant 0 : index
    %18 = vector.load %arg6[%c0_12, %c0_13] : memref<8x128xbf16, #tpu.memory_space<vmem>>, vector<8x128xbf16>
    tpu.vector_store %arg6[%c0_12, %c0_13], %17 {strides = array<i32>} : memref<8x128xbf16, #tpu.memory_space<vmem>>, vector<8x128xbf16>,
    return
  }
  func.func @transform_0(%arg0: i32) -> (i32, i32) {
    %c0_i32 = arith.constant 0 : i32
    %c0_i32_0 = arith.constant 0 : i32
    return %arg0, %c0_i32 : i32, i32
  }
  func.func @transform_1(%arg0: i32) -> (i32, i32) {
    %c0_i32 = arith.constant 0 : i32
    %c0_i32_0 = arith.constant 0 : i32
    %c0_i32_1 = arith.constant 0 : i32
    return %c0_i32, %c0_i32_0 : i32, i32
  }
  func.func @transform_2(%arg0: i32) -> (i32, i32) {
    %c0_i32 = arith.constant 0 : i32
    %c0_i32_0 = arith.constant 0 : i32
    %c0_i32_1 = arith.constant 0 : i32
    return %c0_i32, %c0_i32_0 : i32, i32
  }
  func.func @transform_3(%arg0: i32) -> (i32, i32) {
    %c0_i32 = arith.constant 0 : i32
    %c0_i32_0 = arith.constant 0 : i32
    %c0_i32_1 = arith.constant 0 : i32
    return %c0_i32, %c0_i32_0 : i32, i32
  }
  func.func @transform_4(%arg0: i32) -> (i32, i32) {
    %c0_i32 = arith.constant 0 : i32
    %c0_i32_0 = arith.constant 0 : i32
    %c0_i32_1 = arith.constant 0 : i32
    return %c0_i32, %c0_i32_0 : i32, i32
  }
  func.func @transform_5(%arg0: i32) -> (i32, i32) {
    %c0_i32 = arith.constant 0 : i32
    %c0_i32_0 = arith.constant 0 : i32
    return %arg0, %c0_i32 : i32, i32
  }
}

</mosaic_0001>

<bundles_post_ra>
// kernel: tpu_custom_call.1
= control target key start
LH: loop header
LB: loop body
LE: loop exit
PB: predicated region body
PF: predicated region fallthrough
CT: control target
= control target key end

     0   :  { %10 = vsyncpa [#allocation3], 0  ;;  %s899_s0 = inlined_call_operand.hbm [shape: f32[8,512], index: 0, kind: input, shape index: {}]   ;;  %s900_s1 = inlined_call_operand.hbm [shape: bf16[512,128], index: 1, kind: input, shape index: {}]   ;;  %s901_s2 = inlined_call_operand.vmem [shape: f32[1,128], index: 2, kind: input, shape index: {}]   ;;  %s902_s3 = inlined_call_operand.hbm [shape: bf16[128,128], index: 3, kind: input, shape index: {}]   ;;  %s903_s4 = inlined_call_operand.vmem [shape: f32[1,128], index: 4, kind: input, shape index: {}]   ;;  %s904_s5 = inlined_call_operand.hbm [shape: bf16[8,128], index: 5, kind: output, shape index: {}]  }
   0x1   :  { %11 = vsyncpa [#allocation6], 0 }
   0x2   :  { %12 = vsyncpa [#allocation4], 0  ;;  %s801_s18 = smov [#allocation5]   ;;  %s707_s22 = scalar_lea.hbm %s900_s1, 4096 }
   0x3   :  { %s28_s19 = sshll.u32 %s801_s18, 4  ;;  %p708_p0 = scmp.ne.s32.totalorder %s900_s1, %s707_s22  ;;  %s29_s19 = int_to_ptr.vmem [resolvable:$true] %s28_s19 }
   0x4   :  { %p711_p1 = scmp.lt.u32.totalorder %s707_s22, %s900_s1 }
   0x6   :  { %p713_p2 = pnand %p711_p1, %p708_p0 }
   0x8   :  { %716 = shalt.err (!%p713_p2)
}
   0x9   :  { %s717_s27 = scalar_lea.vmem %s29_s19, 4096  ;;  %p722_p4 = scmp.lt.s32.totalorder %s29_s19, %s29_s19 }
   0xa   :  { %p718_p3 = scmp.ne.s32.totalorder %s29_s19, %s717_s27  ;;  %p723_p5 = scmp.lt.s32.totalorder %s717_s27, %s717_s27 }
   0xc   :  { %p724_p6 = por %p723_p5, %p722_p4 }
   0xe   :  { %p725_p7 = pnand %p724_p6, %p718_p3 }
  0x10   :  { %728 = shalt.err (!%p725_p7)
}
  0x11   :  { %s802_s28 = smov 64   ;;  %s803_s29 = smov 4  }
  0x12   :  { %34 = dma.hbm_to_vmem [thread:$0]  %s900_s1, 4096, %s29_s19, [#allocation6], %s802_s28, %s802_s28, %s803_s29  }
  0x13   :  { %s804_s7 = smov [#allocation2]   ;;  %s805_s9 = smov [#allocation7]  }
  0x14   :  { %s19_s8 = sshll.u32 %s804_s7, 4  ;;  %s42_s10 = sshll.u32 %s805_s9, 4  ;;  %s20_s8 = int_to_ptr.vmem [resolvable:$true] %s19_s8  ;;  %s43_s10 = int_to_ptr.vmem [resolvable:$true] %s42_s10 }
  0x15   :  { %s729_s13 = scalar_lea.hbm %s899_s0, 512 }
  0x16   :  { %p730_p8 = scmp.ne.s32.totalorder %s899_s0, %s729_s13  ;;  %p733_p9 = scmp.lt.u32.totalorder %s729_s13, %s899_s0 }
  0x18   :  { %p735_p10 = pnand %p733_p9, %p730_p8 }
  0x1a   :  { %738 = shalt.err (!%p735_p10)
}
  0x1b   :  { %s739_s1 = scalar_lea.vmem %s20_s8, 512  ;;  %p744_p12 = scmp.lt.s32.totalorder %s20_s8, %s20_s8 }
  0x1c   :  { %p740_p11 = scmp.ne.s32.totalorder %s20_s8, %s739_s1  ;;  %p745_p13 = scmp.lt.s32.totalorder %s739_s1, %s739_s1 }
  0x1e   :  { %p746_p0 = por %p745_p13, %p744_p12 }
  0x20   :  { %p747_p1 = pnand %p746_p0, %p740_p11 }
  0x22   :  { %750 = shalt.err (!%p747_p1)
}
  0x23   :  { %22 = dma.hbm_to_vmem [thread:$0]  %s899_s0, 512, %s20_s8, [#allocation3]  }
  0x24   :  { %s751_s22 = scalar_lea.hbm %s902_s3, 1024 }
  0x25   :  { %p752_p2 = scmp.ne.s32.totalorder %s902_s3, %s751_s22  ;;  %p755_p3 = scmp.lt.u32.totalorder %s751_s22, %s902_s3 }
  0x27   :  { %p757_p4 = pnand %p755_p3, %p752_p2 }
  0x29   :  { %760 = shalt.err (!%p757_p4)
}
  0x2a   :  { %s761_s27 = scalar_lea.vmem %s43_s10, 1024  ;;  %p766_p6 = scmp.lt.s32.totalorder %s43_s10, %s43_s10 }
  0x2b   :  { %p762_p5 = scmp.ne.s32.totalorder %s43_s10, %s761_s27  ;;  %p767_p7 = scmp.lt.s32.totalorder %s761_s27, %s761_s27 }
  0x2d   :  { %p768_p8 = por %p767_p7, %p766_p6 }
  0x2f   :  { %p769_p9 = pnand %p768_p8, %p762_p5 }
  0x31   :  { %772 = shalt.err (!%p769_p9)
}
  0x32   :  { %48 = dma.hbm_to_vmem [thread:$0]  %s902_s3, 1024, %s43_s10, [#allocation6], %s802_s28, %s802_s28, %s803_s29  }
  0x33   :  { %795 = dma.done.wait [#allocation3], 512  }
  0x34   :  { %796 = vsyncadd [#allocation3], 4294966784 }
  0x35   :  { %797 = dma.done.wait [#allocation6], 5120  }
  0x36   :  { %798 = vsyncadd [#allocation6], 4294962176  ;;  %v667_v0 = vld [vmem:[#allocation5 + $0x40] sm:$0xff]   ;;  %v671_v4 = vld [vmem:[#allocation5 + $0x48] sm:$0xff]   ;;  %v806_v39 = vmov 0.0   ;;  %vm807_vm0 = vmmov 0  }
  0x37   :  { %v668_v1 = vld [vmem:[#allocation5 + $0xc0] sm:$0xff]   ;;  %586 = vmatprep.subr.bf16.mxu0 %v667_v0  ;;  %v672_v5 = vld [vmem:[#allocation5 + $0xc8] sm:$0xff]   ;;  %v675_v8 = vld [vmem:[#allocation5 + $0x50] sm:$0xff]  }
  0x38   :  { %v669_v2 = vld [vmem:[#allocation5] sm:$0xff]   ;;  %608 = vmatprep.subr.bf16.mxu1 %v668_v1  ;;  %v673_v6 = vld [vmem:[#allocation5 + $0x8] sm:$0xff]   ;;  %v676_v9 = vld [vmem:[#allocation5 + $0xd0] sm:$0xff]  }
  0x39   :  { %v670_v3 = vld [vmem:[#allocation5 + $0x80] sm:$0xff]   ;;  %587 = vmatpush3.bf16.msra.mxu0 %v669_v2  ;;  %v674_v7 = vld [vmem:[#allocation5 + $0x88] sm:$0xff]   ;;  %v677_v10 = vld [vmem:[#allocation5 + $0x10] sm:$0xff]  }
  0x3a   :  { %609 = vmatpush3.bf16.msra.mxu1 %v670_v3  ;;  %588 = vmatprep.subr.bf16.mxu0 %v671_v4  ;;  %v678_v11 = vld [vmem:[#allocation5 + $0x90] sm:$0xff]   ;;  %v679_v12 = vld [vmem:[#allocation5 + $0x58] sm:$0xff]   ;;  %v683_v16 = vld [vmem:[#allocation5 + $0x60] sm:$0xff]  }
  0x3b   :  { %610 = vmatprep.subr.bf16.mxu1 %v672_v5  ;;  %v680_v13 = vld [vmem:[#allocation5 + $0xd8] sm:$0xff]   ;;  %v684_v17 = vld [vmem:[#allocation5 + $0xe0] sm:$0xff]   ;;  %v687_v20 = vld [vmem:[#allocation5 + $0x68] sm:$0xff]  }
  0x3c   :  { %v681_v14 = vld [vmem:[#allocation5 + $0x18] sm:$0xff]   ;;  %v685_v18 = vld [vmem:[#allocation5 + $0x20] sm:$0xff]   ;;  %v688_v21 = vld [vmem:[#allocation5 + $0xe8] sm:$0xff]  }
  0x3d   :  { %589 = vmatpush3.bf16.msra.mxu0 %v673_v6  ;;  %v682_v15 = vld [vmem:[#allocation5 + $0x98] sm:$0xff]   ;;  %v686_v19 = vld [vmem:[#allocation5 + $0xa0] sm:$0xff]   ;;  %v689_v22 = vld [vmem:[#allocation5 + $0x28] sm:$0xff]  }
  0x3e   :  { %611 = vmatpush3.bf16.msra.mxu1 %v674_v7  ;;  %590 = vmatprep.subr.bf16.mxu0 %v675_v8  ;;  %v690_v23 = vld [vmem:[#allocation5 + $0xa8] sm:$0xff]   ;;  %v691_v24 = vld [vmem:[#allocation5 + $0x70] sm:$0xff]   ;;  %v695_v28 = vld [vmem:[#allocation5 + $0x78] sm:$0xff]  }
  0x3f   :  { %612 = vmatprep.subr.bf16.mxu1 %v676_v9  ;;  %v692_v25 = vld [vmem:[#allocation5 + $0xf0] sm:$0xff]   ;;  %v696_v29 = vld [vmem:[#allocation5 + $0xf8] sm:$0xff]   ;;  %v62_v32 = vld [vmem:[#allocation2 + $0x8] sm:$0xff] }
  0x40   :  { %v693_v26 = vld [vmem:[#allocation5 + $0x30] sm:$0xff]   ;;  %v697_v30 = vld [vmem:[#allocation5 + $0x38] sm:$0xff]   ;;  %v61_v34 = vld [vmem:[#allocation2] sm:$0xff]  ;;  %v66_v35 = vpack.c.bf16 %v62_v32, %v62_v32 }
  0x41   :  { %591 = vmatpush3.bf16.msra.mxu0 %v677_v10  ;;  %v694_v27 = vld [vmem:[#allocation5 + $0xb0] sm:$0xff]   ;;  %v698_v31 = vld [vmem:[#allocation5 + $0xb8] sm:$0xff]   ;;  %v65_v37 = vpack.c.bf16 %v61_v34, %v61_v34  ;;  %v699_v41 = vld [vmem:[#allocation7] sm:$0xff]  }
  0x42   :  { %613 = vmatpush3.bf16.msra.mxu1 %v678_v11  ;;  %592 = vmatprep.subr.bf16.mxu0 %v679_v12  ;;  %v64_v33 = vld [vmem:[#allocation2 + $0x18] sm:$0xff]  ;;  %v63_v38 = vld [vmem:[#allocation2 + $0x10] sm:$0xff]  ;;  %v700_v42 = vld [vmem:[#allocation7 + $0x8] sm:$0xff]  }
  0x43   :  { %614 = vmatprep.subr.bf16.mxu1 %v680_v13  ;;  %v68_v36 = vpack.c.bf16 %v64_v33, %v64_v33  ;;  %v67_v40 = vpack.c.bf16 %v63_v38, %v63_v38  ;;  %364 = vmatprep.mubr.bf16.mxu0 %v66_v35  ;;  %v701_v43 = vld [vmem:[#allocation7 + $0x10] sm:$0xff]   ;;  %v702_v44 = vld [vmem:[#allocation7 + $0x18] sm:$0xff]   ;;  %v703_v45 = vld [vmem:[#allocation7 + $0x20] sm:$0xff]  }
  0x44   :  { %v704_v46 = vld [vmem:[#allocation7 + $0x28] sm:$0xff]   ;;  %v705_v47 = vld [vmem:[#allocation7 + $0x30] sm:$0xff]   ;;  %v706_v48 = vld [vmem:[#allocation7 + $0x38] sm:$0xff]  }
  0x45   :  { %593 = vmatpush3.bf16.msra.mxu0 %v681_v14  ;;  %404 = vmatprep.mubr.bf16.mxu1 %v68_v36  ;;  %v544_v51 = vld [vmem:[%s901_s2] ss:$0 sm:$0xff]  ;;  %s808_s2 = smov [#allocation8]  }
  0x46   :  { %615 = vmatpush3.bf16.msra.mxu1 %v682_v15  ;;  %594 = vmatprep.subr.bf16.mxu0 %v683_v16  ;;  %v577_v0 = vld [vmem:[%s903_s4] ss:$0 sm:$0xff]  ;;  %s534_s7 = sshll.u32 %s808_s2, 4  ;;  %s535_s7 = int_to_ptr.vmem [resolvable:$true] %s534_s7 }
  0x47   :  { %616 = vmatprep.subr.bf16.mxu1 %v684_v17  ;;  %s773_s8 = scalar_lea.vmem %s535_s7, 64  ;;  %p778_p11 = scmp.lt.s32.totalorder %s535_s7, %s535_s7 }
  0x48   :  { %p774_p10 = scmp.ne.s32.totalorder %s535_s7, %s773_s8  ;;  %p779_p12 = scmp.lt.s32.totalorder %s773_s8, %s773_s8 }
  0x49   :  { %595 = vmatpush3.bf16.msra.mxu0 %v685_v18 }
  0x4a   :  { %617 = vmatpush3.bf16.msra.mxu1 %v686_v19  ;;  %596 = vmatprep.subr.bf16.mxu0 %v687_v20  ;;  %p780_p13 = por %p779_p12, %p778_p11 }
  0x4b   :  { %618 = vmatprep.subr.bf16.mxu1 %v688_v21 }
  0x4c   :  { %p781_p0 = pnand %p780_p13, %p774_p10 }
  0x4d   :  { %597 = vmatpush3.bf16.msra.mxu0 %v689_v22 }
  0x4e   :  { %619 = vmatpush3.bf16.msra.mxu1 %v690_v23  ;;  %598 = vmatprep.subr.bf16.mxu0 %v691_v24 }
  0x4f   :  { %620 = vmatprep.subr.bf16.mxu1 %v692_v25 }
  0x51   :  { %599 = vmatpush3.bf16.msra.mxu0 %v693_v26 }
  0x52   :  { %621 = vmatpush3.bf16.msra.mxu1 %v694_v27  ;;  %600 = vmatprep.subr.bf16.mxu0 %v695_v28 }
  0x53   :  { %622 = vmatprep.subr.bf16.mxu1 %v696_v29 }
  0x55   :  { %601 = vmatpush3.bf16.msra.mxu0 %v697_v30 }
  0x56   :  { %623 = vmatpush3.bf16.msra.mxu1 %v698_v31  ;;  %639 = vmatprep.subr.bf16.mxu0 %v806_v39 }
  0x58   :  { %365 = vmatmul.mubr.bf16.vlgmr.msra.gmra.mrb[0].mxu0 %v65_v37 }
  0x59   :  { %405 = vmatmul.mubr.bf16.vlgmr.msra.gmra.mrb[0].mxu1 %v67_v40  ;;  %640 = vmatpush3.bf16.msra.mxu0 %v699_v41 }
  0x5a   :  { %641 = vmatprep.subr.bf16.mxu0 %v806_v39  ;;  %655 = vmatprep.mubr.msk.bf16.mxu0 %vm807_vm0, %v806_v39 }
  0x5d   :  { %642 = vmatpush3.bf16.msra.mxu0 %v700_v42 }
  0x5e   :  { %643 = vmatprep.subr.bf16.mxu0 %v806_v39 }
  0x61   :  { %644 = vmatpush3.bf16.msra.mxu0 %v701_v43 }
  0x62   :  { %645 = vmatprep.subr.bf16.mxu0 %v806_v39 }
  0x65   :  { %646 = vmatpush3.bf16.msra.mxu0 %v702_v44 }
  0x66   :  { %647 = vmatprep.subr.bf16.mxu0 %v806_v39 }
  0x69   :  { %648 = vmatpush3.bf16.msra.mxu0 %v703_v45 }
  0x6a   :  { %649 = vmatprep.subr.bf16.mxu0 %v806_v39 }
  0x6d   :  { %650 = vmatpush3.bf16.msra.mxu0 %v704_v46 }
  0x6e   :  { %651 = vmatprep.subr.bf16.mxu0 %v806_v39 }
  0x71   :  { %652 = vmatpush3.bf16.msra.mxu0 %v705_v47 }
  0x72   :  { %653 = vmatprep.subr.bf16.mxu0 %v806_v39 }
  0x75   :  { %654 = vmatpush3.bf16.msra.mxu0 %v706_v48 }
 0x12b   :  { %v602_v49 = vpop.f32.mrb[0].mxu0 }
 0x12c   :  { %v624_v50 = vpop.f32.mrb[0].mxu1  ;;  %v603_v52 = vpop.f32.mrb[1].mxu0 }
 0x12d   :  { %v625_v53 = vpop.f32.mrb[1].mxu1  ;;  %v604_v54 = vadd.f32 %v603_v52, %v602_v49  ;;  %v605_v56 = vpop.f32.mrb[2].mxu0 }
 0x12e   :  { %v626_v55 = vadd.f32 %v625_v53, %v624_v50  ;;  %v627_v57 = vpop.f32.mrb[2].mxu1  ;;  %v606_v58 = vpop.f32.mrb[3].mxu0 }
 0x12f   :  { %v628_v59 = vpop.f32.mrb[3].mxu1  ;;  %v367_v60 = vadd.f32 %v604_v54, %v544_v51 }
 0x131   :  { %v407_v61 = vadd.f32 %v626_v55, %v367_v60 }
 0x133   :  { %v412_v62 = vmax.f32 %v407_v61, 0.0 }
 0x135   :  { %v413_v63 = vpack.c.bf16 %v412_v62, %v412_v62 }
 0x137   :  { %656 = vmatmul.mubr.bf16.vlgmr.msra.gmra.mrb[4].mxu0 %v413_v63 }
 0x20a   :  { %v519_v1 = vpop.f32.mrb[4].mxu0 }
 0x20b   :  { %v520_v2 = vadd.f32 %v577_v0, %v519_v1  ;;  %v657_v3 = vpop.f32.mrb[5].mxu0 }
 0x20c   :  { %v522_v4 = vpop.f32.mrb[6].mxu0 }
 0x20d   :  { %v525_v5 = vmax.f32 %v520_v2, 0.0  ;;  %v658_v6 = vpop.f32.mrb[7].mxu0 }
 0x20f   :  { %v526_v7 = vpack.c.bf16 %v525_v5, %v525_v5 }
 0x211   :  { %527 = vst [vmem:[#allocation8] sm:$0xf] %v526_v7 }
 0x212   :  { %784 = shalt.err (!%p781_p0)
}
 0x213   :  { %s785_s10 = scalar_lea.hbm %s904_s5, 64 }
 0x214   :  { %p786_p1 = scmp.ne.s32.totalorder %s904_s5, %s785_s10  ;;  %p789_p2 = scmp.lt.u32.totalorder %s785_s10, %s904_s5 }
 0x216   :  { %p791_p3 = pnand %p789_p2, %p786_p1 }
 0x218   :  { %794 = shalt.err (!%p791_p3)
}
 0x219   :  { %537 = dma.vmem_to_hbm [thread:$0]  %s535_s7, 64, %s904_s5, [#allocation4]  }
 0x21a   :  { %799 = dma.done.wait [#allocation4], 64  }
 0x21b   :  { %800 = vsyncadd [#allocation4], 4294967232 }
 0x21c   :  { %541 = vsyncpa [#allocation3], 1 }
 0x21d   :  { %542 = vsyncpa [#allocation6], 1 }
 0x21e   :  { %543 = vsyncpa [#allocation4], 1 }

</bundles_post_ra>
